<compile_context>
chip_gen: v7x
topology: tpu7x:2x2x1
jax: 0.10.0
libtpu: 0.0.40
codegen_flags: <defaults>
</compile_context>

<pallas_src>
import jax
import jax.numpy as jnp
from jax.experimental import pallas as pl
from jax.experimental.pallas import tpu as pltpu


def ses_block_forward(x, w_t, b_row, *, block_batch=None):
    """x: (B, C, H, W).  w_t: (C_in, C_out) pre-transposed conv weight.  b_row: (1, C)."""
    B, C, H, W = x.shape
    HW = H * W
    inv_hw = 1.0 / float(HW)
    xr = x.reshape(B, C, HW)

    # NOTE: when H*W is far from a multiple of 128 (e.g. 7x7) and C is a
    # multiple of 128, a channels-last (B, HW, C) view would be lane-dense;
    # not taken here since it only pays off if the producer already emits NHWC.
    def kernel(x_ref, w_ref, b_ref, o_ref):
        x_blk = x_ref[...]                                        # native dtype (tb, C, HW)
        # Global average pool: f32 accumulation only, no f32 tile copy.
        pooled = jnp.sum(x_blk, axis=-1, dtype=jnp.float32) * inv_hw   # (tb, C)
        # 1x1 conv (C -> C) + sigmoid on the pooled vector.
        gate = jax.nn.sigmoid(
            jnp.dot(pooled, w_ref[...], preferred_element_type=jnp.float32)
            + b_ref[...]
        )                                                         # (tb, C) f32
        # Channel-wise gating in the native dtype (no f32 product tile).
        o_ref[...] = gate.astype(o_ref.dtype)[:, :, None] * x_blk

    itemsize = jnp.dtype(x.dtype).itemsize
    per_sample = max(C * HW * itemsize, 1)

    w_bytes = w_t.size * jnp.dtype(w_t.dtype).itemsize
    b_bytes = b_row.size * jnp.dtype(b_row.dtype).itemsize
    const_bytes = 2 * (w_bytes + b_bytes)          # grid-invariant blocks, double-buffered
    slack = 4 << 20                                # compiler internal-scratch headroom

    # Per-generation VMEM budget (~75% of physical: v7x 64 MiB -> ~48 MiB,
    # v5e/v6e 128 MiB -> ~96 MiB). Conservative fallback if the query fails.
    try:
        vmem_phys = int(pltpu.get_tpu_info().vmem_capacity_bytes)
    except Exception:
        vmem_phys = 64 << 20
    vmem_budget = (vmem_phys * 3) // 4

    if block_batch is None:
        # ~8 MiB per input buffer, bounded by what fits with double-buffered
        # in + out tiles, the constant blocks and slack.
        avail = max(vmem_budget - const_bytes - slack, per_sample * 4)
        per_buf_cap = min(8 << 20, avail // 4)
        tb = max(1, per_buf_cap // per_sample)
        tb = min(tb, B)
        # Megacore split (2 TCs share the grid) only on small-VMEM / v7x-like
        # chips, and only if each core still gets >= ~2 MiB tiles.
        if vmem_phys <= (64 << 20) and B >= 2:
            tb_half = -(-B // 2)
            if tb_half * per_sample >= (2 << 20):
                tb = min(tb, tb_half)
    else:
        tb = min(int(block_batch), B)

    grid = (pl.cdiv(B, tb),)   # ragged last block OK: batch rows are independent

    tile_bytes = tb * per_sample
    needed = 2 * 2 * tile_bytes + const_bytes + slack
    # TODO(synk): for activations where a single (C, HW) sample cannot be
    # double-buffered within physical VMEM, add a spatially-chunked two-pass
    # path (pass 1: per-sample channel sums; pass 2: apply the sigmoid gate).
    vmem_limit = int(needed if needed <= vmem_budget else min(needed, vmem_phys))

    out = pl.pallas_call(
        kernel,
        out_shape=jax.ShapeDtypeStruct((B, C, HW), x.dtype),
        grid=grid,
        in_specs=[
            pl.BlockSpec((tb, C, HW), lambda i: (i, 0, 0)),   # x: tiled over batch
            pl.BlockSpec((C, C), lambda i: (0, 0)),           # weight: constant block
            pl.BlockSpec((1, C), lambda i: (0, 0)),           # bias:   constant block
        ],
        out_specs=pl.BlockSpec((tb, C, HW), lambda i: (i, 0, 0)),
        compiler_params=pltpu.CompilerParams(
            dimension_semantics=("parallel",),
            vmem_limit_bytes=vmem_limit,
        ),
    )(xr, w_t, b_row)
    return out.reshape(B, C, H, W)


def make_params(key, in_feats):
    """Synthetic params matching SES_Block(in_feats): Conv2d(C, C, 1) + bias."""
    kw, kb = jax.random.split(key, 2)
    # Conv2d(C, C, 1): weight (C_out, C_in, 1, 1) -> (C_out, C_in); bias (C_out,)
    weight = jax.random.normal(kw, (in_feats, in_feats), jnp.float32) * 0.1
    bias = jax.random.normal(kb, (in_feats,), jnp.float32) * 0.1
    raw = dict(weight=weight, bias=bias)
    packed = (
        weight.T,                       # (C_in, C_out): pooled @ w_t == pooled @ weight.T
        bias.reshape(1, in_feats),      # (1, C)
    )
    return raw, packed


def reference_forward(x, p):
    """Pure-JAX reference mirroring the PyTorch SES_Block forward."""
    pooled = jnp.mean(x, axis=(2, 3))                               # (B, C)
    w = jax.nn.sigmoid(pooled @ p["weight"].T + p["bias"])          # (B, C)
    return w[:, :, None, None] * x


if __name__ == "__main__":
    B, C, H, W = 2, 32, 16, 16        # HW = 256 -> lane-dense (multiple of 128)
    key = jax.random.PRNGKey(0)
    kx, kp = jax.random.split(key, 2)
    x = jax.random.normal(kx, (B, C, H, W), jnp.float32)

    raw, packed = make_params(kp, C)

    out = ses_block_forward(x, *packed)
    out = jax.block_until_ready(out)

    ref = reference_forward(x, raw)
    assert out.shape == (B, C, H, W)
    assert jnp.allclose(out, ref, atol=1e-5, rtol=1e-5), "mismatch vs reference"

    print("KERNEL_OK")
</pallas_src>

<mosaic_0001>
module attributes {stable_mosaic.version = 11 : i64} {
  func.func @kernel(%arg0: i32, %arg1: memref<2x32x256xf32, #tpu.memory_space<vmem>>, %arg2: memref<32x32xf32, #tpu.memory_space<vmem>>, %arg3: memref<1x32xf32, #tpu.memory_space<vmem>>, %arg4: memref<2x32x256xf32, #tpu.memory_space<vmem>>) attributes {dimension_semantics = [#tpu.dimension_semantics<parallel>], iteration_bounds = array<i64: 1>, scalar_prefetch = 0 : i64, scratch_operands = 0 : i64, tpu.core_type = #tpu.core_type<tc>, window_params = [{transform_indices = @transform_0, window_bounds = array<i64: 2, 32, 256>}, {pipeline_mode = #tpu.pipeline_mode<synchronous>, transform_indices = @transform_1, window_bounds = array<i64: 32, 32>}, {pipeline_mode = #tpu.pipeline_mode<synchronous>, transform_indices = @transform_2, window_bounds = array<i64: 1, 32>}, {transform_indices = @transform_3, window_bounds = array<i64: 2, 32, 256>}]} {
    %c0 = arith.constant 0 : index
    %c0_0 = arith.constant 0 : index
    %c0_1 = arith.constant 0 : index
    %0 = vector.load %arg1[%c0, %c0_0, %c0_1] : memref<2x32x256xf32, #tpu.memory_space<vmem>>, vector<2x32x256xf32>
    %cst = arith.constant dense<0.000000e+00> : vector<2x32xf32>
    %1 = vector.multi_reduction <add>, %0, %cst [2] : vector<2x32x256xf32> to vector<2x32xf32>
    %cst_2 = arith.constant 3.906250e-03 : f32
    %2 = vector.broadcast %cst_2 : f32 to vector<2x32xf32>
    %3 = arith.mulf %1, %2 : vector<2x32xf32>
    %c0_3 = arith.constant 0 : index
    %c0_4 = arith.constant 0 : index
    %4 = vector.load %arg2[%c0_3, %c0_4] : memref<32x32xf32, #tpu.memory_space<vmem>>, vector<32x32xf32>
    %cst_5 = arith.constant dense<0.000000e+00> : vector<2x32xf32>
    %5 = tpu.matmul %3, %4, %cst_5 {dimension_numbers = #tpu.dot_dimension_numbers<[1], [0], [0], [1], [0, 0, 1, 1], [], []>} : vector<2x32xf32>, vector<32x32xf32>, vector<2x32xf32> -> vector<2x32xf32>
    %c0_6 = arith.constant 0 : index
    %c0_7 = arith.constant 0 : index
    %6 = vector.load %arg3[%c0_6, %c0_7] : memref<1x32xf32, #tpu.memory_space<vmem>>, vector<1x32xf32>
    %7 = vector.broadcast %6 : vector<1x32xf32> to vector<2x32xf32>
    %8 = arith.addf %5, %7 : vector<2x32xf32>
    %9 = arith.negf %8 : vector<2x32xf32>
    %10 = math.exp %9 : vector<2x32xf32>
    %cst_8 = arith.constant 1.000000e+00 : f32
    %11 = vector.broadcast %cst_8 : f32 to vector<2x32xf32>
    %12 = arith.addf %11, %10 : vector<2x32xf32>
    %13 = arith.divf %11, %12 : vector<2x32xf32>
    %14 = vector.shape_cast %13 : vector<2x32xf32> to vector<2x32x1xf32>
    %15 = vector.broadcast %14 : vector<2x32x1xf32> to vector<2x32x256xf32>
    %16 = arith.mulf %15, %0 : vector<2x32x256xf32>
    %c0_9 = arith.constant 0 : index
    %c0_10 = arith.constant 0 : index
    %c0_11 = arith.constant 0 : index
    %17 = vector.load %arg4[%c0_9, %c0_10, %c0_11] : memref<2x32x256xf32, #tpu.memory_space<vmem>>, vector<2x32x256xf32>
    tpu.vector_store %arg4[%c0_9, %c0_10, %c0_11], %16 {strides = array<i32>} : memref<2x32x256xf32, #tpu.memory_space<vmem>>, vector<2x32x256xf32>,
    return
  }
  func.func @transform_0(%arg0: i32) -> (i32, i32, i32) {
    %c0_i32 = arith.constant 0 : i32
    %c0_i32_0 = arith.constant 0 : i32
    %c0_i32_1 = arith.constant 0 : i32
    return %arg0, %c0_i32, %c0_i32_0 : i32, i32, i32
  }
  func.func @transform_1(%arg0: i32) -> (i32, i32) {
    %c0_i32 = arith.constant 0 : i32
    %c0_i32_0 = arith.constant 0 : i32
    %c0_i32_1 = arith.constant 0 : i32
    return %c0_i32, %c0_i32_0 : i32, i32
  }
  func.func @transform_2(%arg0: i32) -> (i32, i32) {
    %c0_i32 = arith.constant 0 : i32
    %c0_i32_0 = arith.constant 0 : i32
    %c0_i32_1 = arith.constant 0 : i32
    return %c0_i32, %c0_i32_0 : i32, i32
  }
  func.func @transform_3(%arg0: i32) -> (i32, i32, i32) {
    %c0_i32 = arith.constant 0 : i32
    %c0_i32_0 = arith.constant 0 : i32
    %c0_i32_1 = arith.constant 0 : i32
    return %arg0, %c0_i32, %c0_i32_0 : i32, i32, i32
  }
}

</mosaic_0001>

<bundles_post_ra>
// kernel: tpu_custom_call.1
= control target key start
LH: loop header
LB: loop body
LE: loop exit
PB: predicated region body
PF: predicated region fallthrough
CT: control target
= control target key end

     0   :  { %8 = vsyncpa [#allocation3], 0  ;;  %s575_s0 = inlined_call_operand.hbm [shape: f32[2,32,256], index: 0, kind: input, shape index: {}]   ;;  %s576_s1 = inlined_call_operand.hbm [shape: f32[32,32], index: 1, kind: input, shape index: {}]   ;;  %s577_s2 = inlined_call_operand.vmem [shape: f32[1,32], index: 2, kind: input, shape index: {}]   ;;  %s578_s3 = inlined_call_operand.hbm [shape: f32[2,32,256], index: 3, kind: output, shape index: {}]  }
   0x1   :  { %9 = vsyncpa [#allocation6], 0 }
   0x2   :  { %10 = vsyncpa [#allocation4], 0  ;;  %s436_s12 = smov [#allocation2]   ;;  %s364_s16 = scalar_lea.hbm %s575_s0, 2048 }
   0x3   :  { %s16_s13 = sshll.u32 %s436_s12, 4  ;;  %p365_p0 = scmp.ne.s32.totalorder %s575_s0, %s364_s16  ;;  %s17_s13 = int_to_ptr.vmem [resolvable:$true] %s16_s13 }
   0x4   :  { %p368_p1 = scmp.lt.u32.totalorder %s364_s16, %s575_s0 }
   0x6   :  { %p370_p2 = pnand %p368_p1, %p365_p0 }
   0x8   :  { %373 = shalt.err (!%p370_p2)
}
   0x9   :  { %s374_s21 = scalar_lea.vmem %s17_s13, 2048  ;;  %p379_p4 = scmp.lt.s32.totalorder %s17_s13, %s17_s13 }
   0xa   :  { %p375_p3 = scmp.ne.s32.totalorder %s17_s13, %s374_s21  ;;  %p380_p5 = scmp.lt.s32.totalorder %s374_s21, %s374_s21 }
   0xc   :  { %p381_p6 = por %p380_p5, %p379_p4 }
   0xe   :  { %p382_p7 = pnand %p381_p6, %p375_p3 }
  0x10   :  { %385 = shalt.err (!%p382_p7)
}
  0x11   :  { %s437_s22 = smov 256   ;;  %s438_s23 = smov 16  }
  0x12   :  { %22 = dma.hbm_to_vmem [thread:$0]  %s575_s0, 2048, %s17_s13, [#allocation3], %s437_s22, %s437_s22, %s438_s23  }
  0x13   :  { %s439_s26 = smov [#allocation5]   ;;  %s386_s30 = scalar_lea.hbm %s576_s1, 512 }
  0x14   :  { %s28_s27 = sshll.u32 %s439_s26, 4  ;;  %p387_p8 = scmp.ne.s32.totalorder %s576_s1, %s386_s30  ;;  %s29_s27 = int_to_ptr.vmem [resolvable:$true] %s28_s27 }
  0x15   :  { %p390_p9 = scmp.lt.u32.totalorder %s386_s30, %s576_s1 }
  0x17   :  { %p392_p10 = pnand %p390_p9, %p387_p8 }
  0x19   :  { %395 = shalt.err (!%p392_p10)
}
  0x1a   :  { %s396_s8 = scalar_lea.vmem %s29_s27, 512  ;;  %p401_p12 = scmp.lt.s32.totalorder %s29_s27, %s29_s27 }
  0x1b   :  { %p397_p11 = scmp.ne.s32.totalorder %s29_s27, %s396_s8  ;;  %p402_p13 = scmp.lt.s32.totalorder %s396_s8, %s396_s8 }
  0x1d   :  { %p403_p0 = por %p402_p13, %p401_p12 }
  0x1f   :  { %p404_p1 = pnand %p403_p0, %p397_p11 }
  0x21   :  { %407 = shalt.err (!%p404_p1)
}
  0x22   :  { %s440_s0 = smov 128   ;;  %s441_s9 = smov 8  }
  0x23   :  { %34 = dma.hbm_to_vmem [thread:$0]  %s576_s1, 512, %s29_s27, [#allocation6], %s440_s0, %s440_s0, %s441_s9  }
  0x24   :  { %430 = dma.done.wait [#allocation3], 2048  }
  0x25   :  { %431 = vsyncadd [#allocation3], 4294965248 }
  0x26   :  { %432 = dma.done.wait [#allocation6], 512  }
  0x27   :  { %433 = vsyncadd [#allocation6], 4294966784  ;;  %v493_v0 = vld [vmem:[#allocation2 + $0x40] sm:$0xff]  ;;  %v495_v1 = vld [vmem:[#allocation2 + $0x48] sm:$0xff]  ;;  %v442_v27 = vmov 0.0|0.0   ;;  %vm443_vm0 = vmmov 0   ;;  %v110_v32 = vlaneseq }
  0x28   :  { %v497_v2 = vld [vmem:[#allocation2] sm:$0xff]  ;;  %v71_v3 = vadd.f32 %v495_v1, %v493_v0  ;;  %v501_v4 = vld [vmem:[#allocation2 + $0x8] sm:$0xff]  ;;  %v503_v5 = vld [vmem:[#allocation2 + $0x50] sm:$0xff]  ;;  %344 = vmatprep.subr.bf16.mxu0 %v442_v27  ;;  %v444_v31 = vmov 0.0   ;;  %vm121_vm1 = vcmask 130112   ;;  %vm128_vm2 = vcmask 195712  }
  0x29   :  { %v505_v6 = vld [vmem:[#allocation2 + $0x58] sm:$0xff]  ;;  %v59_v7 = vadd.f32 %v501_v4, %v497_v2  ;;  %v509_v8 = vld [vmem:[#allocation2 + $0x10] sm:$0xff]  ;;  %v517_v12 = vld [vmem:[#allocation2 + $0x60] sm:$0xff]  ;;  %341 = vmatprep.mubr.msk.f32.mxu0 %vm443_vm0, %v444_v31  ;;  %v111_v34 = vand.u32 127, %v110_v32  ;;  %v113_v39 = vshrl.u32 %v110_v32, 7  ;;  %vm135_vm3 = vcmask 261312  }
  0x2a   :  { %v511_v9 = vld [vmem:[#allocation2 + $0x18] sm:$0xff]  ;;  %72 = vadd.xlane.f32.xlu1 %v71_v3  ;;  %v74_v10 = vadd.f32 %v505_v6, %v503_v5  ;;  %v519_v13 = vld [vmem:[#allocation2 + $0x68] sm:$0xff]  ;;  %v521_v14 = vld [vmem:[#allocation2 + $0x20] sm:$0xff]  ;;  %vm156_vm4 = vcmask 1041409   ;;  %vm158_vm5 = vcmask 261120  }
  0x2b   :  { %60 = vadd.xlane.f32.xlu0 %v59_v7  ;;  %v62_v11 = vadd.f32 %v511_v9, %v509_v8  ;;  %v523_v15 = vld [vmem:[#allocation2 + $0x28] sm:$0xff]  ;;  %v77_v16 = vadd.f32 %v519_v13, %v517_v12  ;;  %v529_v18 = vld [vmem:[#allocation2 + $0x70] sm:$0xff]  ;;  %v531_v19 = vld [vmem:[#allocation2 + $0x78] sm:$0xff]  ;;  %v116_v36 = vadd.s32 4294967288, %v111_v34  ;;  %v123_v38 = vadd.s32 4294967280, %v111_v34 }
  0x2c   :  { %v65_v17 = vadd.f32 %v523_v15, %v521_v14  ;;  %v533_v20 = vld [vmem:[#allocation2 + $0x30] sm:$0xff]  ;;  %v535_v21 = vld [vmem:[#allocation2 + $0x38] sm:$0xff]  ;;  %v80_v22 = vadd.f32 %v531_v19, %v529_v18  ;;  %v91_v24 = vld [vmem:[#allocation5] sm:$0xff]  ;;  %v130_v43 = vadd.s32 4294967272, %v111_v34  ;;  %v114_v47 = vsub.s32 %v111_v34, %v113_v39 }
  0x2d   :  { %v68_v23 = vadd.f32 %v535_v21, %v533_v20  ;;  %v92_v25 = vld [vmem:[#allocation5 + $0x8] sm:$0xff]  ;;  %v93_v28 = vld [vmem:[#allocation5 + $0x10] sm:$0xff]  ;;  %v94_v29 = vld [vmem:[#allocation5 + $0x18] sm:$0xff]  ;;  %v119_v41 = vsub.s32 %v116_v36, %v113_v39  ;;  %v126_v45 = vsub.s32 %v123_v38, %v113_v39  ;;  %v239_v32 = vsub.s32 0, %v113_v39 }
  0x2e   :  { %75 = vadd.xlane.f32.xlu1 %v74_v10  ;;  %v345_v26 = vpack.c.bf16 %v92_v25, %v91_v24  ;;  %v348_v30 = vpack.c.bf16 %v94_v29, %v93_v28  ;;  %v133_v54 = vsub.s32 %v130_v43, %v113_v39  ;;  %v325_v25 = vld [vmem:[%s577_s2] ss:$0 sm:$0xff]  ;;  %s445_s2 = smov [#allocation7]  }
  0x2f   :  { %63 = vadd.xlane.f32.xlu0 %v62_v11  ;;  %s312_s13 = sshll.u32 %s445_s2, 4  ;;  %s313_s13 = int_to_ptr.vmem [resolvable:$true] %s312_s13 }
  0x30   :  { %346 = vmatpush3.bf16.msra.mxu0 %v345_v26  ;;  %s408_s14 = scalar_lea.vmem %s313_s13, 2048  ;;  %p413_p3 = scmp.lt.s32.totalorder %s313_s13, %s313_s13 }
  0x31   :  { %347 = vmatprep.subr.bf16.mxu0 %v442_v27  ;;  %p409_p2 = scmp.ne.s32.totalorder %s313_s13, %s408_s14  ;;  %p414_p4 = scmp.lt.s32.totalorder %s408_s14, %s408_s14 }
  0x32   :  { %78 = vadd.xlane.f32.xlu1 %v77_v16 }
  0x33   :  { %66 = vadd.xlane.f32.xlu0 %v65_v17  ;;  %p415_p5 = por %p414_p4, %p413_p3 }
  0x34   :  { %349 = vmatpush3.bf16.msra.mxu0 %v348_v30 }
  0x35   :  { %p416_p6 = pnand %p415_p5, %p409_p2 }
  0x36   :  { %81 = vadd.xlane.f32.xlu1 %v80_v22 }
  0x37   :  { %69 = vadd.xlane.f32.xlu0 %v68_v23 }
  0xb7   :  { %v73_v33 = vpop.xlane.xlu1 %72 }
  0xb8   :  { %v61_v35 = vpop.xlane.xlu0 %60  ;;  %v87_v48 = vmul.f32 0.00390625, %v73_v33 }
  0xb9   :  { %v83_v51 = vmul.f32 0.00390625, %v61_v35  ;;  %v258_v35 = vsub.s32 1, %v113_v39 }
  0xba   :  { %v140_v58 = vrot.slane %v87_v48, %v114_v47 }
  0xbb   :  { %v76_v37 = vpop.xlane.xlu1 %75  ;;  %v115_v62 = vrot.slane %v83_v51, %v114_v47 }
  0xbc   :  { %v64_v40 = vpop.xlane.xlu0 %63  ;;  %v88_v42 = vmul.f32 0.00390625, %v76_v37 }
  0xbd   :  { %v84_v44 = vmul.f32 0.00390625, %v64_v40 }
  0xbe   :  { %v144_v53 = vrot.slane %v88_v42, %v119_v41 }
  0xbf   :  { %v79_v46 = vpop.xlane.xlu1 %78  ;;  %v120_v55 = vrot.slane %v84_v44, %v119_v41 }
  0xc0   :  { %v89_v49 = vmul.f32 0.00390625, %v79_v46  ;;  %v67_v50 = vpop.xlane.xlu0 %66  ;;  %v145_v3 = vsel %vm121_vm1, %v144_v53, %v140_v58 }
  0xc1   :  { %v85_v52 = vmul.f32 0.00390625, %v67_v50  ;;  %v122_v10 = vsel %vm121_vm1, %v120_v55, %v115_v62 }
  0xc2   :  { %v149_v56 = vrot.slane %v89_v49, %v126_v45 }
  0xc3   :  { %v82_v57 = vpop.xlane.xlu1 %81  ;;  %v127_v59 = vrot.slane %v85_v52, %v126_v45 }
  0xc4   :  { %v90_v60 = vmul.f32 0.00390625, %v82_v57  ;;  %v70_v61 = vpop.xlane.xlu0 %69  ;;  %v150_v11 = vsel %vm128_vm2, %v149_v56, %v145_v3 }
  0xc5   :  { %v86_v63 = vmul.f32 0.00390625, %v70_v61  ;;  %v129_v17 = vsel %vm128_vm2, %v127_v59, %v122_v10 }
  0xc6   :  { %v154_v7 = vrot.slane %v90_v60, %v133_v54 }
  0xc7   :  { %v134_v16 = vrot.slane %v86_v63, %v133_v54 }
  0xc8   :  { %v155_v22 = vsel %vm135_vm3, %v154_v7, %v150_v11 }
  0xc9   :  { %v136_v23 = vsel %vm135_vm3, %v134_v16, %v129_v17 }
  0xca   :  { %v157_v24 = vsel %vm156_vm4, %v155_v22, %v136_v23 }
  0xcb   :  { %342 = vmatmul.mubr.msk.f32.vlgmr.msra.gmra.mrb[0].mxu0 %vm158_vm5, %v157_v24 }
 0x19e   :  { %v227_v26 = vpop.f32.mrb[0].mxu0 }
 0x19f   :  { %v228_v27 = vadd.f32 %v325_v25, %v227_v26  ;;  %v343_v28 = vpop.f32.mrb[1].mxu0 }
 0x1a1   :  { %v327_v29 = vmul.f32 -1.442695, %v228_v27 }
 0x1a3   :  { %360 = vpow2.f32 %v327_v29 }
 0x1ad   :  { %v361_v30 = vpop.eup %360 }
 0x1ae   :  { %v234_v31 = vadd.f32 1.0, %v361_v30 }
 0x1b0   :  { %362 = vrcp.f32 %v234_v31 }
 0x1ba   :  { %v363_v33 = vpop.eup %362 }
 0x1bb   :  { %v240_v34 = vrot.slane %v363_v33, %v239_v32  ;;  %v259_v36 = vrot.slane %v363_v33, %v258_v35 }
 0x1bd   :  { %246 = vbcast.lane.b32.xlu1 %v240_v34, 264  ;;  %242 = vbcast.lane.b32.xlu0 %v240_v34, 256 }
 0x1c1   :  { %250 = vbcast.lane.b32.xlu1 %v240_v34, 272  ;;  %261 = vbcast.lane.b32.xlu0 %v259_v36, 256 }
 0x1c5   :  { %254 = vbcast.lane.b32.xlu1 %v240_v34, 280  ;;  %269 = vbcast.lane.b32.xlu0 %v259_v36, 272 }
 0x1c9   :  { %265 = vbcast.lane.b32.xlu1 %v259_v36, 264 }
 0x1cd   :  { %273 = vbcast.lane.b32.xlu1 %v259_v36, 280 }
 0x22f   :  { %v247_v37 = vpop.permute.xlu1 %246  ;;  %v243_v38 = vpop.permute.xlu0 %242 }
 0x230   :  { %v277_v40 = vmul.f32 %v247_v37, %v509_v8  ;;  %v278_v41 = vmul.f32 %v247_v37, %v511_v9  ;;  %v275_v42 = vmul.f32 %v243_v38, %v497_v2  ;;  %v276_v43 = vmul.f32 %v243_v38, %v501_v4 }
 0x232   :  { %293 = vst [vmem:[#allocation7 + $0x10] sm:$0xff] %v277_v40  ;;  %294 = vst [vmem:[#allocation7 + $0x18] sm:$0xff] %v278_v41 }
 0x233   :  { %291 = vst [vmem:[#allocation7] sm:$0xff] %v275_v42  ;;  %292 = vst [vmem:[#allocation7 + $0x8] sm:$0xff] %v276_v43  ;;  %v251_v39 = vpop.permute.xlu1 %250  ;;  %v262_v44 = vpop.permute.xlu0 %261 }
 0x234   :  { %v279_v45 = vmul.f32 %v251_v39, %v521_v14  ;;  %v280_v46 = vmul.f32 %v251_v39, %v523_v15  ;;  %v283_v47 = vmul.f32 %v262_v44, %v493_v0  ;;  %v284_v8 = vmul.f32 %v262_v44, %v495_v1 }
 0x236   :  { %295 = vst [vmem:[#allocation7 + $0x20] sm:$0xff] %v279_v45  ;;  %296 = vst [vmem:[#allocation7 + $0x28] sm:$0xff] %v280_v46 }
 0x237   :  { %299 = vst [vmem:[#allocation7 + $0x40] sm:$0xff] %v283_v47  ;;  %300 = vst [vmem:[#allocation7 + $0x48] sm:$0xff] %v284_v8  ;;  %v255_v2 = vpop.permute.xlu1 %254  ;;  %v270_v4 = vpop.permute.xlu0 %269 }
 0x238   :  { %v281_v9 = vmul.f32 %v255_v2, %v533_v20  ;;  %v282_v48 = vmul.f32 %v255_v2, %v535_v21  ;;  %v287_v49 = vmul.f32 %v270_v4, %v517_v12  ;;  %v288_v14 = vmul.f32 %v270_v4, %v519_v13 }
 0x23a   :  { %297 = vst [vmem:[#allocation7 + $0x30] sm:$0xff] %v281_v9  ;;  %298 = vst [vmem:[#allocation7 + $0x38] sm:$0xff] %v282_v48 }
 0x23b   :  { %303 = vst [vmem:[#allocation7 + $0x60] sm:$0xff] %v287_v49  ;;  %304 = vst [vmem:[#allocation7 + $0x68] sm:$0xff] %v288_v14  ;;  %v266_v0 = vpop.permute.xlu1 %265 }
 0x23c   :  { %v285_v1 = vmul.f32 %v266_v0, %v503_v5  ;;  %v286_v15 = vmul.f32 %v266_v0, %v505_v6 }
 0x23e   :  { %301 = vst [vmem:[#allocation7 + $0x50] sm:$0xff] %v285_v1  ;;  %302 = vst [vmem:[#allocation7 + $0x58] sm:$0xff] %v286_v15 }
 0x23f   :  { %v274_v20 = vpop.permute.xlu1 %273 }
 0x240   :  { %v289_v21 = vmul.f32 %v274_v20, %v529_v18  ;;  %v290_v12 = vmul.f32 %v274_v20, %v531_v19 }
 0x242   :  { %305 = vst [vmem:[#allocation7 + $0x70] sm:$0xff] %v289_v21  ;;  %306 = vst [vmem:[#allocation7 + $0x78] sm:$0xff] %v290_v12 }
 0x243   :  { %419 = shalt.err (!%p416_p6)
}
 0x244   :  { %s420_s17 = scalar_lea.hbm %s578_s3, 2048 }
 0x245   :  { %p421_p7 = scmp.ne.s32.totalorder %s578_s3, %s420_s17  ;;  %p424_p8 = scmp.lt.u32.totalorder %s420_s17, %s578_s3 }
 0x247   :  { %p426_p9 = pnand %p424_p8, %p421_p7 }
 0x249   :  { %429 = shalt.err (!%p426_p9)
}
 0x24a   :  { %318 = dma.vmem_to_hbm [thread:$0]  %s313_s13, 2048, %s578_s3, [#allocation4], %s437_s22, %s437_s22, %s438_s23  }
 0x24b   :  { %434 = dma.done.wait [#allocation4], 2048  }
 0x24c   :  { %435 = vsyncadd [#allocation4], 4294965248 }
 0x24d   :  { %322 = vsyncpa [#allocation3], 1 }
 0x24e   :  { %323 = vsyncpa [#allocation6], 1 }
 0x24f   :  { %324 = vsyncpa [#allocation4], 1 }

</bundles_post_ra>
